<compile_context>
chip_gen: v6e
topology: v6e:2x2x1
jax: 0.10.0
libtpu: 0.0.40
codegen_flags: <defaults>
</compile_context>

<pallas_src>
import functools
import math

import jax
import jax.numpy as jnp
from jax.experimental import pallas as pl
from jax.experimental.pallas import tpu as pltpu


# ------------------------------ helpers -------------------------------------

def _largest_divisor_leq(n, cap):
    cap = max(1, min(n, cap))
    for d in range(cap, 0, -1):
        if n % d == 0:
            return d
    return 1


# ------------------------------ Pallas kernel -------------------------------

def _make_conv_kernel(NB, C, O, KH, KW, Wp, M, OH, OW, pack, compact):
    """Fused conv kernel for a block of NB images.

    x_ref : (NB, C, L)        width-padded, HW-flattened images (L covers the
                              KW-1 tail thanks to the extra zero H row)
    w_ref : (O, KH*KW*C)      scaled, packed weights (column = tap*C + chan)
    o_ref : (NB, O, OH, OW)   compact NCHW output          (compact=True)
            (NB, O, M)        stride-1 output slab          (compact=False)
    scratch (pack=True): (KH*KW*C, M) VMEM stack of shifted windows.
    """
    KK = KH * KW

    def kernel(x_ref, w_ref, o_ref, *scratch):
        for b in range(NB):                      # static unroll over the block
            if pack:
                # Realign every tap window ONCE into the K-stacked scratch,
                # then a single long-K MXU dot (no per-tap VPU accumulate).
                stack_ref = scratch[0]
                for kh in range(KH):
                    for kw in range(KW):
                        t = kh * KW + kw
                        off = kh * Wp + kw
                        stack_ref[t * C:(t + 1) * C, :] = x_ref[b, :, off:off + M]
                acc = jnp.dot(w_ref[...], stack_ref[...],
                              preferred_element_type=jnp.float32)
            else:
                # C >= 128: per-tap K already fills the MXU; plain shifted-GEMM.
                acc = jnp.zeros((O, M), jnp.float32)
                for kh in range(KH):
                    for kw in range(KW):
                        t = kh * KW + kw
                        off = kh * Wp + kw
                        acc = acc + jnp.dot(
                            w_ref[:, t * C:(t + 1) * C],
                            x_ref[b, :, off:off + M],
                            preferred_element_type=jnp.float32)

            acc = acc.astype(o_ref.dtype)
            if compact:
                # Write the valid NCHW output directly: row r of the output is
                # the length-OW window at lane offset r*Wp of the slab.  This
                # removes the post-kernel HBM slice pass entirely.
                for r in range(OH):
                    o_ref[b, :, r, :] = acc[:, r * Wp:r * Wp + OW]
            else:
                o_ref[b] = acc

    return kernel


# ------------------------------ forward wrapper -----------------------------

@functools.partial(jax.jit, static_argnums=(2, 3, 4, 5, 6))
def conv2d_forward(x, w_packed, KH, KW, padding_num, stride, compute_dtype):
    """Equivalent of F.conv2d(x, weight*scale, padding=(0, pad), stride=s)."""
    N, C, H, W = x.shape
    O, KKC = w_packed.shape
    assert KKC == KH * KW * C
    pad = int(padding_num)
    s = int(stride)

    Hp, Wp = H, W + 2 * pad
    OH1 = Hp - KH + 1                    # stride-1 rows computed in-kernel
    M = OH1 * Wp                         # stride-1 flattened slab width
    OH = (Hp - KH) // s + 1              # valid (module) output extents
    OW = (Wp - KW) // s + 1

    # --- single fused pad ----------------------------------------------------
    # Width zero-pad (PyTorch padding=(0, pad)) and, when KW > 1, one extra
    # zero H row that doubles as the KW-1 flat tail pad (Wp >= KW-1 always).
    extra_h = 1 if KW > 1 else 0
    x_pad = jnp.pad(x, ((0, 0), (0, 0), (0, extra_h), (pad, pad)))
    x_flat = x_pad.reshape(N, C, (Hp + extra_h) * Wp).astype(compute_dtype)
    L = x_flat.shape[-1]
    w_in = w_packed.astype(compute_dtype)

    pack = C < 128                       # K-pack taps only while the MXU is underfilled
    compact = (s == 1 and OH <= 128)     # compact in-kernel NCHW write path

    # --- batch blocking (NB images per grid step) -----------------------------
    esize = jnp.dtype(compute_dtype).itemsize
    osize = x.dtype.itemsize
    bytes_in = C * L * esize
    bytes_out = O * (OH * OW if compact else M) * osize
    per_img = 2 * (bytes_in + bytes_out)              # double-buffered blocks
    fixed = (KH * KW * C * M * esize if pack else 0) + 2 * O * KKC * esize
    budget = 20 * 1024 * 1024                         # fits v5e/v6e/v7x scoped VMEM
    nb_cap = max(1, (budget - fixed) // max(per_img, 1))
    if N >= 2:
        nb_cap = min(nb_cap, N // 2)     # keep grid >= 2 so v7x megacore stays busy
    NB = _largest_divisor_leq(N, nb_cap)
    grid = (N // NB,)
    # TODO(synk): for very large C*H*W add a spatial (OH-row-chunk) grid axis
    # instead of one full-image block, to stay inside v7x's 64 MiB VMEM.

    kernel = _make_conv_kernel(NB, C, O, KH, KW, Wp, M, OH, OW, pack, compact)
    scratch_shapes = ([pltpu.VMEM((KH * KW * C, M), compute_dtype)]
                      if pack else [])

    if compact:
        out_shape = jax.ShapeDtypeStruct((N, O, OH, OW), x.dtype)
        out_spec = pl.BlockSpec((NB, O, OH, OW), lambda n: (n, 0, 0, 0))
    else:
        out_shape = jax.ShapeDtypeStruct((N, O, M), x.dtype)
        out_spec = pl.BlockSpec((NB, O, M), lambda n: (n, 0, 0))

    out = pl.pallas_call(
        kernel,
        out_shape=out_shape,
        grid_spec=pltpu.PrefetchScalarGridSpec(
            num_scalar_prefetch=0,
            grid=grid,
            in_specs=[
                pl.BlockSpec((NB, C, L), lambda n: (n, 0, 0)),
                pl.BlockSpec((O, KKC), lambda n: (0, 0)),
            ],
            out_specs=out_spec,
            scratch_shapes=scratch_shapes,
        ),
        compiler_params=pltpu.CompilerParams(
            dimension_semantics=("parallel",),
            vmem_limit_bytes=32 * 1024 * 1024),
    )(x_flat, w_in)

    if compact:
        return out

    # Fallback (stride > 1 or very tall outputs): stride-1 slab + wrapper
    # reshape/subsample.
    # TODO(synk): a dedicated strided / row-tiled kernel path would avoid the
    # s^2 overcompute and this extra HBM slice pass for stride > 1.
    out = out.reshape(N, O, OH1, Wp)
    return out[:, :, :(OH - 1) * s + 1:s, :(OW - 1) * s + 1:s]


# ------------------------------ Module port ----------------------------------

class Conv2dLayer:
    """JAX/Pallas port of the PyTorch Conv2dLayer (forward pass only)."""

    def __init__(self, input_channels, output_channels, kernel_size_h,
                 kernel_size_w, padding_num, stride_width, lr_mul, key,
                 compute_dtype=jnp.float32):
        self.stride_width = int(stride_width)
        self.padding_num = int(padding_num)
        self.kernel_size_h = int(kernel_size_h)
        self.kernel_size_w = int(kernel_size_w)
        self.compute_dtype = compute_dtype
        # torch.randn then normal_(mean=0, std=1/lr_mul) -> N(0, (1/lr_mul)^2).
        self.weight = (1.0 / lr_mul) * jax.random.normal(
            key, (output_channels, input_channels, kernel_size_h, kernel_size_w),
            dtype=jnp.float32)
        self.weight_scale = (
            1.0 / math.sqrt(input_channels * kernel_size_h * kernel_size_w)
            * lr_mul)
        # Fold weight * weight_scale once into the kernel-ready packed layout
        # (O, KH*KW*C): column (kh*KW + kw)*C + c matches the scratch rows.
        self._w_packed = (
            (self.weight * self.weight_scale)
            .transpose(0, 2, 3, 1)
            .reshape(output_channels,
                     kernel_size_h * kernel_size_w * input_channels))

    def __call__(self, x):
        return conv2d_forward(x, self._w_packed, self.kernel_size_h,
                              self.kernel_size_w, self.padding_num,
                              self.stride_width, self.compute_dtype)


# --------------------------------- main ---------------------------------------

if __name__ == "__main__":
    key = jax.random.PRNGKey(0)
    k_w, k_x, k_w2 = jax.random.split(key, 3)

    # Small, module-consistent shapes.
    N, C, H, W = 2, 4, 16, 16
    O, KH, KW = 8, 3, 3

    x = jax.random.normal(k_x, (N, C, H, W), dtype=jnp.float32)

    # stride-1 path: compact in-kernel NCHW write, no post-kernel slice.
    layer = Conv2dLayer(C, O, KH, KW, padding_num=1, stride_width=1,
                        lr_mul=1.0, key=k_w)
    out = jax.block_until_ready(layer(x))
    ref = jax.lax.conv_general_dilated(
        x, layer.weight * layer.weight_scale,
        window_strides=(1, 1), padding=((0, 0), (1, 1)),
        dimension_numbers=("NCHW", "OIHW", "NCHW"))
    assert out.shape == ref.shape, (out.shape, ref.shape)
    assert jnp.allclose(out, ref, atol=1e-3, rtol=1e-3), float(
        jnp.max(jnp.abs(out - ref)))

    # stride-2 path: slab kernel + wrapper subsample fallback.
    layer2 = Conv2dLayer(C, O, KH, KW, padding_num=1, stride_width=2,
                         lr_mul=2.0, key=k_w2)
    out2 = jax.block_until_ready(layer2(x))
    ref2 = jax.lax.conv_general_dilated(
        x, layer2.weight * layer2.weight_scale,
        window_strides=(2, 2), padding=((0, 0), (1, 1)),
        dimension_numbers=("NCHW", "OIHW", "NCHW"))
    assert out2.shape == ref2.shape, (out2.shape, ref2.shape)
    assert jnp.allclose(out2, ref2, atol=1e-3, rtol=1e-3), float(
        jnp.max(jnp.abs(out2 - ref2)))

    print("KERNEL_OK")
</pallas_src>

<mosaic_0001>
module attributes {stable_mosaic.version = 11 : i64} {
  func.func @kernel(%arg0: i32, %arg1: memref<1x4x306xf32, #tpu.memory_space<vmem>>, %arg2: memref<8x36xf32, #tpu.memory_space<vmem>>, %arg3: memref<1x8x14x16xf32, #tpu.memory_space<vmem>>, %arg4: memref<36x252xf32, #tpu.memory_space<vmem>>) attributes {dimension_semantics = [#tpu.dimension_semantics<parallel>], iteration_bounds = array<i64: 2>, scalar_prefetch = 0 : i64, scratch_operands = 1 : i64, tpu.core_type = #tpu.core_type<tc>, window_params = [{transform_indices = @transform_0, window_bounds = array<i64: 1, 4, 306>}, {pipeline_mode = #tpu.pipeline_mode<synchronous>, transform_indices = @transform_1, window_bounds = array<i64: 8, 36>}, {transform_indices = @transform_2, window_bounds = array<i64: 1, 8, 14, 16>}]} {
    %c0 = arith.constant 0 : index
    %c0_0 = arith.constant 0 : index
    %c0_1 = arith.constant 0 : index
    %0 = vector.load %arg1[%c0, %c0_0, %c0_1] : memref<1x4x306xf32, #tpu.memory_space<vmem>>, vector<1x4x252xf32>
    %1 = vector.shape_cast %0 : vector<1x4x252xf32> to vector<4x252xf32>
    %c0_2 = arith.constant 0 : index
    %c0_3 = arith.constant 0 : index
    %2 = vector.load %arg4[%c0_2, %c0_3] : memref<36x252xf32, #tpu.memory_space<vmem>>, vector<4x252xf32>
    tpu.vector_store %arg4[%c0_2, %c0_3], %1 {strides = array<i32>} : memref<36x252xf32, #tpu.memory_space<vmem>>, vector<4x252xf32>,
    %c0_4 = arith.constant 0 : index
    %c0_5 = arith.constant 0 : index
    %c1 = arith.constant 1 : index
    %3 = vector.load %arg1[%c0_4, %c0_5, %c1] : memref<1x4x306xf32, #tpu.memory_space<vmem>>, vector<1x4x252xf32>
    %4 = vector.shape_cast %3 : vector<1x4x252xf32> to vector<4x252xf32>
    %c4 = arith.constant 4 : index
    %c0_6 = arith.constant 0 : index
    %5 = vector.load %arg4[%c4, %c0_6] : memref<36x252xf32, #tpu.memory_space<vmem>>, vector<4x252xf32>
    tpu.vector_store %arg4[%c4, %c0_6], %4 {strides = array<i32>} : memref<36x252xf32, #tpu.memory_space<vmem>>, vector<4x252xf32>,
    %c0_7 = arith.constant 0 : index
    %c0_8 = arith.constant 0 : index
    %c2 = arith.constant 2 : index
    %6 = vector.load %arg1[%c0_7, %c0_8, %c2] : memref<1x4x306xf32, #tpu.memory_space<vmem>>, vector<1x4x252xf32>
    %7 = vector.shape_cast %6 : vector<1x4x252xf32> to vector<4x252xf32>
    %c8 = arith.constant 8 : index
    %c0_9 = arith.constant 0 : index
    %8 = vector.load %arg4[%c8, %c0_9] : memref<36x252xf32, #tpu.memory_space<vmem>>, vector<4x252xf32>
    tpu.vector_store %arg4[%c8, %c0_9], %7 {strides = array<i32>} : memref<36x252xf32, #tpu.memory_space<vmem>>, vector<4x252xf32>,
    %c0_10 = arith.constant 0 : index
    %c0_11 = arith.constant 0 : index
    %c18 = arith.constant 18 : index
    %9 = vector.load %arg1[%c0_10, %c0_11, %c18] : memref<1x4x306xf32, #tpu.memory_space<vmem>>, vector<1x4x252xf32>
    %10 = vector.shape_cast %9 : vector<1x4x252xf32> to vector<4x252xf32>
    %c12 = arith.constant 12 : index
    %c0_12 = arith.constant 0 : index
    %11 = vector.load %arg4[%c12, %c0_12] : memref<36x252xf32, #tpu.memory_space<vmem>>, vector<4x252xf32>
    tpu.vector_store %arg4[%c12, %c0_12], %10 {strides = array<i32>} : memref<36x252xf32, #tpu.memory_space<vmem>>, vector<4x252xf32>,
    %c0_13 = arith.constant 0 : index
    %c0_14 = arith.constant 0 : index
    %c19 = arith.constant 19 : index
    %12 = vector.load %arg1[%c0_13, %c0_14, %c19] : memref<1x4x306xf32, #tpu.memory_space<vmem>>, vector<1x4x252xf32>
    %13 = vector.shape_cast %12 : vector<1x4x252xf32> to vector<4x252xf32>
    %c16 = arith.constant 16 : index
    %c0_15 = arith.constant 0 : index
    %14 = vector.load %arg4[%c16, %c0_15] : memref<36x252xf32, #tpu.memory_space<vmem>>, vector<4x252xf32>
    tpu.vector_store %arg4[%c16, %c0_15], %13 {strides = array<i32>} : memref<36x252xf32, #tpu.memory_space<vmem>>, vector<4x252xf32>,
    %c0_16 = arith.constant 0 : index
    %c0_17 = arith.constant 0 : index
    %c20 = arith.constant 20 : index
    %15 = vector.load %arg1[%c0_16, %c0_17, %c20] : memref<1x4x306xf32, #tpu.memory_space<vmem>>, vector<1x4x252xf32>
    %16 = vector.shape_cast %15 : vector<1x4x252xf32> to vector<4x252xf32>
    %c20_18 = arith.constant 20 : index
    %c0_19 = arith.constant 0 : index
    %17 = vector.load %arg4[%c20_18, %c0_19] : memref<36x252xf32, #tpu.memory_space<vmem>>, vector<4x252xf32>
    tpu.vector_store %arg4[%c20_18, %c0_19], %16 {strides = array<i32>} : memref<36x252xf32, #tpu.memory_space<vmem>>, vector<4x252xf32>,
    %c0_20 = arith.constant 0 : index
    %c0_21 = arith.constant 0 : index
    %c36 = arith.constant 36 : index
    %18 = vector.load %arg1[%c0_20, %c0_21, %c36] : memref<1x4x306xf32, #tpu.memory_space<vmem>>, vector<1x4x252xf32>
    %19 = vector.shape_cast %18 : vector<1x4x252xf32> to vector<4x252xf32>
    %c24 = arith.constant 24 : index
    %c0_22 = arith.constant 0 : index
    %20 = vector.load %arg4[%c24, %c0_22] : memref<36x252xf32, #tpu.memory_space<vmem>>, vector<4x252xf32>
    tpu.vector_store %arg4[%c24, %c0_22], %19 {strides = array<i32>} : memref<36x252xf32, #tpu.memory_space<vmem>>, vector<4x252xf32>,
    %c0_23 = arith.constant 0 : index
    %c0_24 = arith.constant 0 : index
    %c37 = arith.constant 37 : index
    %21 = vector.load %arg1[%c0_23, %c0_24, %c37] : memref<1x4x306xf32, #tpu.memory_space<vmem>>, vector<1x4x252xf32>
    %22 = vector.shape_cast %21 : vector<1x4x252xf32> to vector<4x252xf32>
    %c28 = arith.constant 28 : index
    %c0_25 = arith.constant 0 : index
    %23 = vector.load %arg4[%c28, %c0_25] : memref<36x252xf32, #tpu.memory_space<vmem>>, vector<4x252xf32>
    tpu.vector_store %arg4[%c28, %c0_25], %22 {strides = array<i32>} : memref<36x252xf32, #tpu.memory_space<vmem>>, vector<4x252xf32>,
    %c0_26 = arith.constant 0 : index
    %c0_27 = arith.constant 0 : index
    %c38 = arith.constant 38 : index
    %24 = vector.load %arg1[%c0_26, %c0_27, %c38] : memref<1x4x306xf32, #tpu.memory_space<vmem>>, vector<1x4x252xf32>
    %25 = vector.shape_cast %24 : vector<1x4x252xf32> to vector<4x252xf32>
    %c32 = arith.constant 32 : index
    %c0_28 = arith.constant 0 : index
    %26 = vector.load %arg4[%c32, %c0_28] : memref<36x252xf32, #tpu.memory_space<vmem>>, vector<4x252xf32>
    tpu.vector_store %arg4[%c32, %c0_28], %25 {strides = array<i32>} : memref<36x252xf32, #tpu.memory_space<vmem>>, vector<4x252xf32>,
    %c0_29 = arith.constant 0 : index
    %c0_30 = arith.constant 0 : index
    %27 = vector.load %arg2[%c0_29, %c0_30] : memref<8x36xf32, #tpu.memory_space<vmem>>, vector<8x36xf32>
    %c0_31 = arith.constant 0 : index
    %c0_32 = arith.constant 0 : index
    %28 = vector.load %arg4[%c0_31, %c0_32] : memref<36x252xf32, #tpu.memory_space<vmem>>, vector<36x252xf32>
    %cst = arith.constant dense<0.000000e+00> : vector<8x252xf32>
    %29 = tpu.matmul %27, %28, %cst {dimension_numbers = #tpu.dot_dimension_numbers<[1], [0], [0], [1], [0, 0, 1, 1], [], []>} : vector<8x36xf32>, vector<36x252xf32>, vector<8x252xf32> -> vector<8x252xf32>
    %30 = vector.extract_strided_slice %29 {offsets = [0, 0], sizes = [8, 16], strides = [1, 1]} : vector<8x252xf32> to vector<8x16xf32>
    %c0_33 = arith.constant 0 : index
    %c0_34 = arith.constant 0 : index
    %c0_35 = arith.constant 0 : index
    %c0_36 = arith.constant 0 : index
    %31 = vector.load %arg3[%c0_33, %c0_34, %c0_35, %c0_36] : memref<1x8x14x16xf32, #tpu.memory_space<vmem>>, vector<1x8x1x16xf32>
    %32 = vector.shape_cast %31 : vector<1x8x1x16xf32> to vector<8x16xf32>
    %33 = vector.shape_cast %30 : vector<8x16xf32> to vector<1x8x1x16xf32>
    tpu.vector_store %arg3[%c0_33, %c0_34, %c0_35, %c0_36], %33 {strides = array<i32>} : memref<1x8x14x16xf32, #tpu.memory_space<vmem>>, vector<1x8x1x16xf32>,
    %34 = vector.extract_strided_slice %29 {offsets = [0, 18], sizes = [8, 16], strides = [1, 1]} : vector<8x252xf32> to vector<8x16xf32>
    %c0_37 = arith.constant 0 : index
    %c0_38 = arith.constant 0 : index
    %c1_39 = arith.constant 1 : index
    %c0_40 = arith.constant 0 : index
    %35 = vector.load %arg3[%c0_37, %c0_38, %c1_39, %c0_40] : memref<1x8x14x16xf32, #tpu.memory_space<vmem>>, vector<1x8x1x16xf32>
    %36 = vector.shape_cast %35 : vector<1x8x1x16xf32> to vector<8x16xf32>
    %37 = vector.shape_cast %34 : vector<8x16xf32> to vector<1x8x1x16xf32>
    tpu.vector_store %arg3[%c0_37, %c0_38, %c1_39, %c0_40], %37 {strides = array<i32>} : memref<1x8x14x16xf32, #tpu.memory_space<vmem>>, vector<1x8x1x16xf32>,
    %38 = vector.extract_strided_slice %29 {offsets = [0, 36], sizes = [8, 16], strides = [1, 1]} : vector<8x252xf32> to vector<8x16xf32>
    %c0_41 = arith.constant 0 : index
    %c0_42 = arith.constant 0 : index
    %c2_43 = arith.constant 2 : index
    %c0_44 = arith.constant 0 : index
    %39 = vector.load %arg3[%c0_41, %c0_42, %c2_43, %c0_44] : memref<1x8x14x16xf32, #tpu.memory_space<vmem>>, vector<1x8x1x16xf32>
    %40 = vector.shape_cast %39 : vector<1x8x1x16xf32> to vector<8x16xf32>
    %41 = vector.shape_cast %38 : vector<8x16xf32> to vector<1x8x1x16xf32>
    tpu.vector_store %arg3[%c0_41, %c0_42, %c2_43, %c0_44], %41 {strides = array<i32>} : memref<1x8x14x16xf32, #tpu.memory_space<vmem>>, vector<1x8x1x16xf32>,
    %42 = vector.extract_strided_slice %29 {offsets = [0, 54], sizes = [8, 16], strides = [1, 1]} : vector<8x252xf32> to vector<8x16xf32>
    %c0_45 = arith.constant 0 : index
    %c0_46 = arith.constant 0 : index
    %c3 = arith.constant 3 : index
    %c0_47 = arith.constant 0 : index
    %43 = vector.load %arg3[%c0_45, %c0_46, %c3, %c0_47] : memref<1x8x14x16xf32, #tpu.memory_space<vmem>>, vector<1x8x1x16xf32>
    %44 = vector.shape_cast %43 : vector<1x8x1x16xf32> to vector<8x16xf32>
    %45 = vector.shape_cast %42 : vector<8x16xf32> to vector<1x8x1x16xf32>
    tpu.vector_store %arg3[%c0_45, %c0_46, %c3, %c0_47], %45 {strides = array<i32>} : memref<1x8x14x16xf32, #tpu.memory_space<vmem>>, vector<1x8x1x16xf32>,
    %46 = vector.extract_strided_slice %29 {offsets = [0, 72], sizes = [8, 16], strides = [1, 1]} : vector<8x252xf32> to vector<8x16xf32>
    %c0_48 = arith.constant 0 : index
    %c0_49 = arith.constant 0 : index
    %c4_50 = arith.constant 4 : index
    %c0_51 = arith.constant 0 : index
    %47 = vector.load %arg3[%c0_48, %c0_49, %c4_50, %c0_51] : memref<1x8x14x16xf32, #tpu.memory_space<vmem>>, vector<1x8x1x16xf32>
    %48 = vector.shape_cast %47 : vector<1x8x1x16xf32> to vector<8x16xf32>
    %49 = vector.shape_cast %46 : vector<8x16xf32> to vector<1x8x1x16xf32>
    tpu.vector_store %arg3[%c0_48, %c0_49, %c4_50, %c0_51], %49 {strides = array<i32>} : memref<1x8x14x16xf32, #tpu.memory_space<vmem>>, vector<1x8x1x16xf32>,
    %50 = vector.extract_strided_slice %29 {offsets = [0, 90], sizes = [8, 16], strides = [1, 1]} : vector<8x252xf32> to vector<8x16xf32>
    %c0_52 = arith.constant 0 : index
    %c0_53 = arith.constant 0 : index
    %c5 = arith.constant 5 : index
    %c0_54 = arith.constant 0 : index
    %51 = vector.load %arg3[%c0_52, %c0_53, %c5, %c0_54] : memref<1x8x14x16xf32, #tpu.memory_space<vmem>>, vector<1x8x1x16xf32>
    %52 = vector.shape_cast %51 : vector<1x8x1x16xf32> to vector<8x16xf32>
    %53 = vector.shape_cast %50 : vector<8x16xf32> to vector<1x8x1x16xf32>
    tpu.vector_store %arg3[%c0_52, %c0_53, %c5, %c0_54], %53 {strides = array<i32>} : memref<1x8x14x16xf32, #tpu.memory_space<vmem>>, vector<1x8x1x16xf32>,
    %54 = vector.extract_strided_slice %29 {offsets = [0, 108], sizes = [8, 16], strides = [1, 1]} : vector<8x252xf32> to vector<8x16xf32>
    %c0_55 = arith.constant 0 : index
    %c0_56 = arith.constant 0 : index
    %c6 = arith.constant 6 : index
    %c0_57 = arith.constant 0 : index
    %55 = vector.load %arg3[%c0_55, %c0_56, %c6, %c0_57] : memref<1x8x14x16xf32, #tpu.memory_space<vmem>>, vector<1x8x1x16xf32>
    %56 = vector.shape_cast %55 : vector<1x8x1x16xf32> to vector<8x16xf32>
    %57 = vector.shape_cast %54 : vector<8x16xf32> to vector<1x8x1x16xf32>
    tpu.vector_store %arg3[%c0_55, %c0_56, %c6, %c0_57], %57 {strides = array<i32>} : memref<1x8x14x16xf32, #tpu.memory_space<vmem>>, vector<1x8x1x16xf32>,
    %58 = vector.extract_strided_slice %29 {offsets = [0, 126], sizes = [8, 16], strides = [1, 1]} : vector<8x252xf32> to vector<8x16xf32>
    %c0_58 = arith.constant 0 : index
    %c0_59 = arith.constant 0 : index
    %c7 = arith.constant 7 : index
    %c0_60 = arith.constant 0 : index
    %59 = vector.load %arg3[%c0_58, %c0_59, %c7, %c0_60] : memref<1x8x14x16xf32, #tpu.memory_space<vmem>>, vector<1x8x1x16xf32>
    %60 = vector.shape_cast %59 : vector<1x8x1x16xf32> to vector<8x16xf32>
    %61 = vector.shape_cast %58 : vector<8x16xf32> to vector<1x8x1x16xf32>
    tpu.vector_store %arg3[%c0_58, %c0_59, %c7, %c0_60], %61 {strides = array<i32>} : memref<1x8x14x16xf32, #tpu.memory_space<vmem>>, vector<1x8x1x16xf32>,
    %62 = vector.extract_strided_slice %29 {offsets = [0, 144], sizes = [8, 16], strides = [1, 1]} : vector<8x252xf32> to vector<8x16xf32>
    %c0_61 = arith.constant 0 : index
    %c0_62 = arith.constant 0 : index
    %c8_63 = arith.constant 8 : index
    %c0_64 = arith.constant 0 : index
    %63 = vector.load %arg3[%c0_61, %c0_62, %c8_63, %c0_64] : memref<1x8x14x16xf32, #tpu.memory_space<vmem>>, vector<1x8x1x16xf32>
    %64 = vector.shape_cast %63 : vector<1x8x1x16xf32> to vector<8x16xf32>
    %65 = vector.shape_cast %62 : vector<8x16xf32> to vector<1x8x1x16xf32>
    tpu.vector_store %arg3[%c0_61, %c0_62, %c8_63, %c0_64], %65 {strides = array<i32>} : memref<1x8x14x16xf32, #tpu.memory_space<vmem>>, vector<1x8x1x16xf32>,
    %66 = vector.extract_strided_slice %29 {offsets = [0, 162], sizes = [8, 16], strides = [1, 1]} : vector<8x252xf32> to vector<8x16xf32>
    %c0_65 = arith.constant 0 : index
    %c0_66 = arith.constant 0 : index
    %c9 = arith.constant 9 : index
    %c0_67 = arith.constant 0 : index
    %67 = vector.load %arg3[%c0_65, %c0_66, %c9, %c0_67] : memref<1x8x14x16xf32, #tpu.memory_space<vmem>>, vector<1x8x1x16xf32>
    %68 = vector.shape_cast %67 : vector<1x8x1x16xf32> to vector<8x16xf32>
    %69 = vector.shape_cast %66 : vector<8x16xf32> to vector<1x8x1x16xf32>
    tpu.vector_store %arg3[%c0_65, %c0_66, %c9, %c0_67], %69 {strides = array<i32>} : memref<1x8x14x16xf32, #tpu.memory_space<vmem>>, vector<1x8x1x16xf32>,
    %70 = vector.extract_strided_slice %29 {offsets = [0, 180], sizes = [8, 16], strides = [1, 1]} : vector<8x252xf32> to vector<8x16xf32>
    %c0_68 = arith.constant 0 : index
    %c0_69 = arith.constant 0 : index
    %c10 = arith.constant 10 : index
    %c0_70 = arith.constant 0 : index
    %71 = vector.load %arg3[%c0_68, %c0_69, %c10, %c0_70] : memref<1x8x14x16xf32, #tpu.memory_space<vmem>>, vector<1x8x1x16xf32>
    %72 = vector.shape_cast %71 : vector<1x8x1x16xf32> to vector<8x16xf32>
    %73 = vector.shape_cast %70 : vector<8x16xf32> to vector<1x8x1x16xf32>
    tpu.vector_store %arg3[%c0_68, %c0_69, %c10, %c0_70], %73 {strides = array<i32>} : memref<1x8x14x16xf32, #tpu.memory_space<vmem>>, vector<1x8x1x16xf32>,
    %74 = vector.extract_strided_slice %29 {offsets = [0, 198], sizes = [8, 16], strides = [1, 1]} : vector<8x252xf32> to vector<8x16xf32>
    %c0_71 = arith.constant 0 : index
    %c0_72 = arith.constant 0 : index
    %c11 = arith.constant 11 : index
    %c0_73 = arith.constant 0 : index
    %75 = vector.load %arg3[%c0_71, %c0_72, %c11, %c0_73] : memref<1x8x14x16xf32, #tpu.memory_space<vmem>>, vector<1x8x1x16xf32>
    %76 = vector.shape_cast %75 : vector<1x8x1x16xf32> to vector<8x16xf32>
    %77 = vector.shape_cast %74 : vector<8x16xf32> to vector<1x8x1x16xf32>
    tpu.vector_store %arg3[%c0_71, %c0_72, %c11, %c0_73], %77 {strides = array<i32>} : memref<1x8x14x16xf32, #tpu.memory_space<vmem>>, vector<1x8x1x16xf32>,
    %78 = vector.extract_strided_slice %29 {offsets = [0, 216], sizes = [8, 16], strides = [1, 1]} : vector<8x252xf32> to vector<8x16xf32>
    %c0_74 = arith.constant 0 : index
    %c0_75 = arith.constant 0 : index
    %c12_76 = arith.constant 12 : index
    %c0_77 = arith.constant 0 : index
    %79 = vector.load %arg3[%c0_74, %c0_75, %c12_76, %c0_77] : memref<1x8x14x16xf32, #tpu.memory_space<vmem>>, vector<1x8x1x16xf32>
    %80 = vector.shape_cast %79 : vector<1x8x1x16xf32> to vector<8x16xf32>
    %81 = vector.shape_cast %78 : vector<8x16xf32> to vector<1x8x1x16xf32>
    tpu.vector_store %arg3[%c0_74, %c0_75, %c12_76, %c0_77], %81 {strides = array<i32>} : memref<1x8x14x16xf32, #tpu.memory_space<vmem>>, vector<1x8x1x16xf32>,
    %82 = vector.extract_strided_slice %29 {offsets = [0, 234], sizes = [8, 16], strides = [1, 1]} : vector<8x252xf32> to vector<8x16xf32>
    %c0_78 = arith.constant 0 : index
    %c0_79 = arith.constant 0 : index
    %c13 = arith.constant 13 : index
    %c0_80 = arith.constant 0 : index
    %83 = vector.load %arg3[%c0_78, %c0_79, %c13, %c0_80] : memref<1x8x14x16xf32, #tpu.memory_space<vmem>>, vector<1x8x1x16xf32>
    %84 = vector.shape_cast %83 : vector<1x8x1x16xf32> to vector<8x16xf32>
    %85 = vector.shape_cast %82 : vector<8x16xf32> to vector<1x8x1x16xf32>
    tpu.vector_store %arg3[%c0_78, %c0_79, %c13, %c0_80], %85 {strides = array<i32>} : memref<1x8x14x16xf32, #tpu.memory_space<vmem>>, vector<1x8x1x16xf32>,
    return
  }
  func.func @transform_0(%arg0: i32) -> (i32, i32, i32) {
    %c0_i32 = arith.constant 0 : i32
    %c0_i32_0 = arith.constant 0 : i32
    %c0_i32_1 = arith.constant 0 : i32
    return %arg0, %c0_i32, %c0_i32_0 : i32, i32, i32
  }
  func.func @transform_1(%arg0: i32) -> (i32, i32) {
    %c0_i32 = arith.constant 0 : i32
    %c0_i32_0 = arith.constant 0 : i32
    %c0_i32_1 = arith.constant 0 : i32
    return %c0_i32, %c0_i32_0 : i32, i32
  }
  func.func @transform_2(%arg0: i32) -> (i32, i32, i32, i32) {
    %c0_i32 = arith.constant 0 : i32
    %c0_i32_0 = arith.constant 0 : i32
    %c0_i32_1 = arith.constant 0 : i32
    %c0_i32_2 = arith.constant 0 : i32
    return %arg0, %c0_i32, %c0_i32_0, %c0_i32_1 : i32, i32, i32, i32
  }
}

</mosaic_0001>

<bundles_post_ra>
// kernel: conv2d_forward.1
= control target key start
LH: loop header
LB: loop body
LE: loop exit
PB: predicated region body
PF: predicated region fallthrough
CT: control target
= control target key end

     0   :  { %s1266_s9 = smov 0   ;;  %s1926_s0 = inlined_call_operand.vmem [shape: f32[2,4,306], index: 0, kind: input, shape index: {}]   ;;  %s1927_s1 = inlined_call_operand.vmem [shape: f32[8,36], index: 1, kind: input, shape index: {}]   ;;  %s1928_s2 = inlined_call_operand.vmem [shape: f32[2,8,14,16], index: 2, kind: output, shape index: {}]  }
   0x1 LB: > { %s1173_s10 = sadd.s32 4294967295, %s1228_s9   ;;  %p1177_p0 = scmp.ge.s32.totalorder %s1228_s9, 1  ;;  %s1228_s9 = sphi %s1266_s9, %s12_s9  }
   0x2   : > { %p112_p1 = scmp.lt.s32.totalorder %s1228_s9, 3 }
   0x4   : > { %p113_p2 = pnand %p1177_p0, %p112_p1 }
   0x5   : > { %p134_p3 = scmp.lt.s32.totalorder (!%p113_p2), %s1173_s10, 1  ;;  %s1230_s15 = smov (!%p113_p2), 90  }
   0x6   : > { %116 = sbr.rel (%p113_p2) target bundleno = 719 (0x2cf), region = 28  ;;  %s1231_s16 = smov (!%p113_p2), 91  }
   0x7   : > { %s1232_s17 = smov (!%p113_p2), 92   ;;  %s1233_s18 = smov (!%p113_p2), 109  }
   0x8   : > { %s1234_s19 = smov (!%p113_p2), 108   ;;  %s1235_s20 = smov (!%p113_p2), 110  }
   0x9   : > { %s1236_s21 = smov (!%p113_p2), 126   ;;  %s1238_s22 = smov (!%p113_p2), 127  }
   0xa   : > { %s1240_s29 = smov (!%p113_p2), 74   ;;  %s1241_s30 = smov (!%p113_p2), 56  }
   0xb   : > { %s1930_s10 = smov (!%p134_p3, %s1173_s10), 1  ;;  %vm149_vm0 = vcmask 1010688   ;;  %v1237_v9 = vmov 0.0   ;;  %vm282_vm1 = vcmask 736256   ;;  %vm245_vm2 = vcmask 752640   ;;  %v289_v55 = vld [vmem:[%s1927_s1] sm:$0xff] }
   0xc   : > { %s1187_s11 = smul.u32 12, %s1930_s10  ;;  %375 = vmatprep.mubr.f32.mxu0 %v1237_v9  ;;  %vm264_vm3 = vcmask 744448   ;;  %vm163_vm4 = vcmask 1014788   ;;  %vm304_vm5 = vcmask 1043456   ;;  %vm208_vm6 = vcmask 891904   ;;  %s1186_s25 = sshll.u32 %s1930_s10, 7 }
   0xd   : > { %vm227_vm7 = vcmask 883712   ;;  %vm190_vm8 = vcmask 900096   ;;  %vm172_vm9 = vcmask 1031168   ;;  %vm158_vm10 = vcmask 1039360   ;;  %s1314_s28 = scalar_lea.vmem %s1928_s2, %s1186_s25  ;;  %s1242_s3 = smov 38  }
   0xe   : > { %s1280_s14 = scalar_lea.vmem %s1926_s0, %s1187_s11  ;;  %vm300_vm11 = vcmask 293888   ;;  %v1239_v57 = vmov 1966171168   ;;  %v387_v59 = vlaneseq  ;;  %vm440_vm12 = vcmask 122880   ;;  %s1243_s4 = smov 20  }
   0xf   : > { %v272_v0 = vld [vmem:[%s1280_s14 + $0x8] sm:$0xf]  ;;  %v271_v1 = vld [vmem:[%s1280_s14] sm:$0xff]  ;;  %v385_v58 = vunpack.c.l.s4 %v1239_v57  ;;  %s1244_s5 = smov 112   ;;  %s1245_s6 = smov 2   ;;  %vm820_vm13 = vcmask 15360  }
  0x10   : > { %280 = vrot.lane.b32.xlu0 %v272_v0, %s1230_s15  ;;  %276 = vrot.lane.b32.xlu1 %v271_v1, %s1230_s15  ;;  %v275_v2 = vcombine.high %v271_v1, %v271_v1  ;;  %148 = vst [vmem:[#allocation2] sm:$0xf] %v271_v1  ;;  %v235_v3 = vld [vmem:[%s1280_s14 + $0x8] sm:$0xf]  ;;  %v256_v5 = vcombine.low %v271_v1, %v271_v1  ;;  %v388_v61 = vshrl.u32 %v387_v59, 7  ;;  %s1246_s7 = smov 94  }
  0x11   : > { %v1219_v4 = vld [vmem:[%s1280_s14 + $0x8] ss:$0 sps:$4 sm:$0xff]   ;;  %v386_v60 = vunpack.c.0.s8 %v385_v58  ;;  %s1247_s8 = smov 76   ;;  %s1248_s10 = smov 58  }
  0x12   : > { %150 = vst.msk [vmem:[#allocation2 + $0x8] sm:$0xf] %vm149_vm0, %v275_v2  ;;  %v198_v6 = vld [vmem:[%s1280_s14 + $0x8] sm:$0xf]  ;;  %s1249_s11 = smov 40   ;;  %s1250_s12 = smov 22  }
  0x13   : > { %v1220_v7 = vld [vmem:[%s1280_s14 + $0x8] ss:$0 sps:$4 sm:$0xff]   ;;  %v1307_v62 = vsub.s32 %v386_v60, %v388_v61 }
  0x14   : > { %260 = vrot.lane.b32.xlu1 %v271_v1, %s1231_s16  ;;  %243 = vrot.lane.b32.xlu0 %v235_v3, %s1232_s17  ;;  %v1221_v8 = vld [vmem:[%s1280_s14 + $0x8] ss:$0 sps:$4 sm:$0xff]  }
  0x18   : > { %278 = vrot.lane.b32.xlu0 %v275_v2, %s1230_s15  ;;  %241 = vrot.lane.b32.xlu1 %v275_v2, %s1232_s17 }
  0x1c   : > { %262 = vrot.lane.b32.xlu0 %v1219_v4, %s1231_s16  ;;  %239 = vrot.lane.b32.xlu1 %v271_v1, %s1232_s17 }
  0x20   : > { %258 = vrot.lane.b32.xlu0 %v256_v5, %s1231_s16  ;;  %204 = vrot.lane.b32.xlu1 %v275_v2, %s1233_s18 }
  0x24   : > { %206 = vrot.lane.b32.xlu0 %v198_v6, %s1233_s18  ;;  %223 = vrot.lane.b32.xlu1 %v271_v1, %s1234_s19 }
  0x28   : > { %225 = vrot.lane.b32.xlu0 %v1220_v7, %s1234_s19  ;;  %202 = vrot.lane.b32.xlu1 %v271_v1, %s1233_s18 }
  0x2c   : > { %221 = vrot.lane.b32.xlu0 %v256_v5, %s1234_s19  ;;  %186 = vrot.lane.b32.xlu1 %v271_v1, %s1235_s20 }
  0x30   : > { %188 = vrot.lane.b32.xlu0 %v1221_v8, %s1235_s20  ;;  %168 = vrot.lane.b32.xlu1 %v271_v1, %s1236_s21 }
  0x34   : > { %184 = vrot.lane.b32.xlu1 %v256_v5, %s1235_s20  ;;  %170 = vrot.lane.b32.xlu0 %v275_v2, %s1236_s21  ;;  %v1316_v2 = vsub.s32 0, %v388_v61 }
  0x38   : > { %156 = vrot.lane.b32.xlu1 %v271_v1, %s1238_s22  ;;  %154 = vrot.lane.b32.xlu0 %v256_v5, %s1238_s22 }
  0x82   : > { %v281_v10 = vpop.permute.xlu0 %280  ;;  %v277_v11 = vpop.permute.xlu1 %276 }
  0x86   : > { %v261_v12 = vpop.permute.xlu1 %260  ;;  %v244_v13 = vpop.permute.xlu0 %243 }
  0x8a   : > { %v279_v14 = vpop.permute.xlu0 %278  ;;  %v242_v15 = vpop.permute.xlu1 %241 }
  0x8b   : > { %v283_v16 = vsel %vm282_vm1, %v277_v11, %v279_v14  ;;  %v284_v17 = vsel %vm282_vm1, %v279_v14, %v281_v10  ;;  %v247_v18 = vsel %vm245_vm2, %v242_v15, %v244_v13 }
  0x8c   : > { %287 = vst [vmem:[#allocation2 + $0x40] sm:$0xf] %v283_v16  ;;  %288 = vst.msk [vmem:[#allocation2 + $0x48] sm:$0xf] %vm149_vm0, %v284_v17 }
  0x8d   : > { %251 = vst.msk [vmem:[#allocation2 + $0x38] sm:$0xf] %vm149_vm0, %v247_v18 }
  0x8e   : > { %v263_v19 = vpop.permute.xlu0 %262  ;;  %v240_v20 = vpop.permute.xlu1 %239 }
  0x8f   : > { %v266_v21 = vsel %vm264_vm3, %v261_v12, %v263_v19  ;;  %v246_v22 = vsel %vm245_vm2, %v240_v20, %v242_v15 }
  0x90   : > { %270 = vst.msk [vmem:[#allocation2 + $0x38] sm:$0xf0] %vm163_vm4, %v266_v21  ;;  %250 = vst [vmem:[#allocation2 + $0x30] sm:$0xf] %v246_v22 }
  0x92   : > { %v259_v23 = vpop.permute.xlu0 %258  ;;  %v205_v24 = vpop.permute.xlu1 %204 }
  0x93   : > { %v265_v25 = vsel %vm264_vm3, %v259_v23, %v261_v12  ;;  %v299_v26 = vld [vmem:[#allocation2 + $0x48] sm:$0xf]  ;;  %v298_v27 = vld [vmem:[#allocation2 + $0x40] sm:$0xf] }
  0x94   : > { %269 = vst [vmem:[#allocation2 + $0x30] sm:$0xf0] %v265_v25  ;;  %1181 = vmatprep.subr.msk.mxu0 %vm304_vm5, %v299_v26 }
  0x95   : > { %1182 = vmatpush1.msk.msra.mxu0 %vm304_vm5, %v298_v27 }
  0x96   : > { %v207_v28 = vpop.permute.xlu0 %206  ;;  %v224_v29 = vpop.permute.xlu1 %223 }
  0x97   : > { %v210_v30 = vsel %vm208_vm6, %v205_v24, %v207_v28  ;;  %v297_v31 = vld [vmem:[#allocation2 + $0x38] sm:$0xff] }
  0x98   : > { %214 = vst.msk [vmem:[#allocation2 + $0x28] sm:$0xf] %vm149_vm0, %v210_v30  ;;  %335 = vmatprep.subr.mxu0 %v297_v31 }
  0x9a   : > { %v226_v32 = vpop.permute.xlu0 %225  ;;  %v203_v33 = vpop.permute.xlu1 %202 }
  0x9b   : > { %v229_v34 = vsel %vm227_vm7, %v224_v29, %v226_v32  ;;  %v209_v35 = vsel %vm208_vm6, %v203_v33, %v205_v24  ;;  %v296_v36 = vld [vmem:[#allocation2 + $0x30] sm:$0xff]  ;;  %v1355_v24 = vsub.s32 1, %v388_v61 }
  0x9c   : > { %233 = vst.msk [vmem:[#allocation2 + $0x28] sm:$0xf0] %vm163_vm4, %v229_v34  ;;  %213 = vst [vmem:[#allocation2 + $0x20] sm:$0xf] %v209_v35  ;;  %336 = vmatpush1.msra.mxu0 %v296_v36 }
  0x9e   : > { %v222_v37 = vpop.permute.xlu0 %221  ;;  %v187_v38 = vpop.permute.xlu1 %186 }
  0x9f   : > { %v228_v39 = vsel %vm227_vm7, %v222_v37, %v224_v29 }
  0xa0   : > { %232 = vst [vmem:[#allocation2 + $0x20] sm:$0xf0] %v228_v39 }
  0xa2   : > { %v189_v40 = vpop.permute.xlu0 %188  ;;  %v169_v41 = vpop.permute.xlu1 %168 }
  0xa3   : > { %v192_v42 = vsel %vm190_vm8, %v187_v38, %v189_v40  ;;  %v295_v43 = vld [vmem:[#allocation2 + $0x28] sm:$0xff] }
  0xa4   : > { %196 = vst.msk [vmem:[#allocation2 + $0x18] sm:$0xf0] %vm163_vm4, %v192_v42  ;;  %337 = vmatprep.subr.mxu0 %v295_v43 }
  0xa6   : > { %v185_v44 = vpop.permute.xlu1 %184  ;;  %v171_v45 = vpop.permute.xlu0 %170 }
  0xa7   : > { %v191_v46 = vsel %vm190_vm8, %v185_v44, %v187_v38  ;;  %v173_v47 = vsel %vm172_vm9, %v169_v41, %v171_v45  ;;  %177 = vst.msk [vmem:[#allocation2 + $0x18] sm:$0xf] %vm149_vm0, %v171_v45  ;;  %v294_v48 = vld [vmem:[#allocation2 + $0x20] sm:$0xff] }
  0xa8   : > { %195 = vst [vmem:[#allocation2 + $0x10] sm:$0xf0] %v191_v46  ;;  %176 = vst [vmem:[#allocation2 + $0x10] sm:$0xf] %v173_v47  ;;  %338 = vmatpush1.msra.mxu0 %v294_v48 }
  0xaa   : > { %v157_v49 = vpop.permute.xlu1 %156  ;;  %v155_v50 = vpop.permute.xlu0 %154 }
  0xab   : > { %164 = vst.msk [vmem:[#allocation2 + $0x8] sm:$0xf0] %vm163_vm4, %v157_v49  ;;  %v159_v51 = vsel %vm158_vm10, %v155_v50, %v157_v49 }
  0xac   : > { %162 = vst [vmem:[#allocation2] sm:$0xf0] %v159_v51 }
  0xae   : > { %v293_v52 = vld [vmem:[#allocation2 + $0x18] sm:$0xff] }
  0xaf   : > { %339 = vmatprep.subr.mxu0 %v293_v52  ;;  %v292_v53 = vld [vmem:[#allocation2 + $0x10] sm:$0xff] }
  0xb0   : > { %340 = vmatpush1.msra.mxu0 %v292_v53 }
  0xb2   : > { %v291_v54 = vld [vmem:[#allocation2 + $0x8] sm:$0xff] }
  0xb3   : > { %341 = vmatprep.subr.mxu0 %v291_v54  ;;  %v290_v56 = vld [vmem:[#allocation2] sm:$0xff] }
  0xb4   : > { %342 = vmatpush1.msra.mxu0 %v290_v56 }
  0xb5   : > { %1183 = vmatmul.mubr.msk.f32.vlgmr.msra.gmra.mxu0 %vm300_vm11, %v289_v55 }
 0x175   : > { %v377_v63 = vpop.f32.mrf.mxu0 }
 0x176   : > { %v383_v0 = vcombine.high %v377_v63, %v377_v63  ;;  %v390_v1 = vrot.slane %v377_v63, %v1307_v62 }
 0x177   : > { %v379_v3 = vpop.f32.mrf.mxu0 }
 0x178   : > { %v397_v4 = vrot.slane %v383_v0, %v1307_v62  ;;  %v398_v5 = vcombine.high %v390_v1, %v390_v1  ;;  %v406_v6 = vrot.slane %v390_v1, %v1307_v62  ;;  %v674_v7 = vcombine.low %v377_v63, %v379_v3 }
 0x179   : > { %v675_v8 = vcombine.high %v377_v63, %v379_v3  ;;  %v845_v9 = vcombine.high %v379_v3, %v379_v3  ;;  %v852_v10 = vrot.slane %v379_v3, %v1307_v62 }
 0x17a   : > { %v399_v11 = vcombine.high %v397_v4, %v397_v4  ;;  %v1322_v12 = vrot.slane %v397_v4, %v1307_v62  ;;  %v420_v13 = vrot.slane %v398_v5, %v1307_v62  ;;  %v1325_v14 = vcombine.high %v406_v6, %v406_v6  ;;  %441 = vst.msk [vmem:[%s1314_s28] sm:$0x1] %vm440_vm12, %v406_v6 }
 0x17b   : > { %v1330_v15 = vrot.slane %v406_v6, %v1316_v2  ;;  %v682_v16 = vrot.slane %v674_v7, %v1307_v62  ;;  %v689_v17 = vrot.slane %v675_v8, %v1307_v62  ;;  %v859_v18 = vrot.slane %v845_v9, %v1307_v62 }
 0x17c   : > { %v1336_v19 = vrot.slane %v399_v11, %v1307_v62  ;;  %v429_v20 = vcombine.high %v1322_v12, %v1322_v12  ;;  %v1340_v21 = vcombine.high %v420_v13, %v420_v13  ;;  %442 = vst.msk [vmem:[%s1314_s28 + $0x10] sm:$0x1] %vm440_vm12, %v420_v13  ;;  %443 = vst.msk [vmem:[%s1314_s28 + $0x20] sm:$0x1] %vm440_vm12, %v1325_v14 }
 0x17d   : > { %445 = vst.msk [vmem:[%s1314_s28 + $0x40] sm:$0x1] %vm440_vm12, %v1322_v12  ;;  %v1351_v22 = vrot.slane %v420_v13, %v1316_v2  ;;  %v690_v23 = vcombine.high %v682_v16, %v682_v16  ;;  %481 = vrot.lane.b32.xlu0 %v1330_v15, %s1235_s20  ;;  %v691_v27 = vcombine.high %v689_v17, %v689_v17 }
 0x17e   : > { %v431_v25 = vcombine.high %v1336_v19, %v1336_v19  ;;  %444 = vst.msk [vmem:[%s1314_s28 + $0x30] sm:$0x1] %vm440_vm12, %v1340_v21  ;;  %446 = vst.msk [vmem:[%s1314_s28 + $0x50] sm:$0x1] %vm440_vm12, %v1336_v19  ;;  %v1368_v26 = vrot.slane %v429_v20, %v1316_v2  ;;  %v1373_v28 = vrot.slane %v682_v16, %v1307_v62 }
 0x17f   : > { %447 = vst.msk [vmem:[%s1314_s28 + $0x60] sm:$0x1] %vm440_vm12, %v429_v20  ;;  %483 = vrot.lane.b32.xlu1 %v1351_v22, %s1235_s20  ;;  %v1376_v29 = vrot.slane %v689_v17, %v1307_v62  ;;  %v860_v30 = vcombine.high %v852_v10, %v852_v10  ;;  %v861_v31 = vcombine.high %v859_v18, %v859_v18 }
 0x180   : > { %448 = vst.msk [vmem:[%s1314_s28 + $0x70] sm:$0x1] %vm440_vm12, %v431_v25  ;;  %v868_v32 = vrot.slane %v852_v10, %v1307_v62  ;;  %v875_v33 = vrot.slane %v859_v18, %v1307_v62  ;;  %v1383_v34 = vrot.slane %v431_v25, %v1316_v2  ;;  %v1386_v35 = vrot.slane %v690_v23, %v1307_v62 }
 0x181   : > { %v882_v36 = vrot.slane %v860_v30, %v1307_v62  ;;  %v889_v37 = vrot.slane %v861_v31, %v1307_v62  ;;  %513 = vrot.lane.b32.xlu0 %v1330_v15, %s1232_s17  ;;  %v731_v38 = vrot.slane %v1373_v28, %v1355_v24  ;;  %v763_v39 = vrot.slane %v1376_v29, %v1355_v24 }
 0x182   : > { %v890_v40 = vcombine.high %v868_v32, %v868_v32  ;;  %v891_v41 = vcombine.high %v875_v33, %v875_v33  ;;  %v1397_v42 = vrot.slane %v868_v32, %v1316_v2  ;;  %v1400_v43 = vrot.slane %v875_v33, %v1316_v2 }
 0x183   : > { %515 = vrot.lane.b32.xlu1 %v1351_v22, %s1232_s17  ;;  %v892_v44 = vcombine.high %v882_v36, %v882_v36  ;;  %v893_v45 = vcombine.high %v889_v37, %v889_v37  ;;  %v1405_v46 = vrot.slane %v882_v36, %v1316_v2  ;;  %v1408_v47 = vrot.slane %v889_v37, %v1316_v2 }
 0x184   : > { %v1411_v48 = vrot.slane %v890_v40, %v1316_v2  ;;  %v1414_v49 = vrot.slane %v891_v41, %v1316_v2  ;;  %v727_v50 = vrot.slane %v1373_v28, %v1316_v2  ;;  %v759_v51 = vrot.slane %v1376_v29, %v1316_v2 }
 0x185   : > { %v1421_v52 = vrot.slane %v892_v44, %v1316_v2  ;;  %v1424_v53 = vrot.slane %v893_v45, %v1316_v2  ;;  %545 = vrot.lane.b32.xlu0 %v1330_v15, %s1240_s29  ;;  %v739_v54 = vrot.slane %v1386_v35, %v1355_v24  ;;  %v1432_v55 = vcombine.high %v1373_v28, %v1373_v28 }
 0x186   : > { %v1437_v56 = vrot.slane %v691_v27, %v1307_v62  ;;  %v1441_v57 = vcombine.high %v1376_v29, %v1376_v29  ;;  %v735_v58 = vrot.slane %v1386_v35, %v1316_v2  ;;  %v1447_v59 = vcombine.high %v1386_v35, %v1386_v35 }
 0x187   : > { %547 = vrot.lane.b32.xlu1 %v1351_v22, %s1240_s29  ;;  %v747_v60 = vrot.slane %v1432_v55, %v1355_v24  ;;  %v743_v61 = vrot.slane %v1432_v55, %v1316_v2  ;;  %v460_v8 = vrot.slane %v1325_v14, %v1316_v2  ;;  %v464_v9 = vrot.slane %v1340_v21, %v1316_v2 }
 0x188   : > { %v771_v62 = vrot.slane %v1437_v56, %v1355_v24  ;;  %v779_v63 = vrot.slane %v1441_v57, %v1355_v24  ;;  %v767_v0 = vrot.slane %v1437_v56, %v1316_v2  ;;  %v775_v1 = vrot.slane %v1441_v57, %v1316_v2 }
 0x189   : > { %577 = vrot.lane.b32.xlu0 %v1330_v15, %s1241_s30  ;;  %v755_v3 = vrot.slane %v1447_v59, %v1355_v24  ;;  %v1467_v4 = vcombine.high %v1437_v56, %v1437_v56  ;;  %v751_v5 = vrot.slane %v1447_v59, %v1316_v2  ;;  %v468_v10 = vrot.slane %v1322_v12, %v1316_v2 }
 0x18a   : > { %v472_v11 = vrot.slane %v1336_v19, %v1316_v2 }
 0x18b   : > { %579 = vrot.lane.b32.xlu1 %v1351_v22, %s1241_s30  ;;  %v787_v6 = vrot.slane %v1467_v4, %v1355_v24  ;;  %v783_v7 = vrot.slane %v1467_v4, %v1316_v2 }
 0x18d   : > { %609 = vrot.lane.b32.xlu0 %v1330_v15, %s1242_s3 }
 0x18f   : > { %611 = vrot.lane.b32.xlu1 %v1351_v22, %s1242_s3 }
 0x191   : > { %641 = vrot.lane.b32.xlu0 %v1330_v15, %s1243_s4 }
 0x193   : > { %643 = vrot.lane.b32.xlu1 %v1351_v22, %s1243_s4 }
 0x195   : > { %485 = vrot.lane.b32.xlu0 %v460_v8, %s1235_s20 }
 0x197   : > { %487 = vrot.lane.b32.xlu1 %v464_v9, %s1235_s20 }
 0x199   : > { %489 = vrot.lane.b32.xlu0 %v468_v10, %s1235_s20 }
 0x19b   : > { %491 = vrot.lane.b32.xlu1 %v472_v11, %s1235_s20 }
 0x19d   : > { %517 = vrot.lane.b32.xlu0 %v460_v8, %s1232_s17 }
 0x19f   : > { %519 = vrot.lane.b32.xlu1 %v464_v9, %s1232_s17 }
 0x1a1   : > { %521 = vrot.lane.b32.xlu0 %v468_v10, %s1232_s17 }
 0x1a3   : > { %523 = vrot.lane.b32.xlu1 %v472_v11, %s1232_s17 }
 0x1a5   : > { %549 = vrot.lane.b32.xlu0 %v460_v8, %s1240_s29 }
 0x1a7   : > { %551 = vrot.lane.b32.xlu1 %v464_v9, %s1240_s29 }
 0x1a9   : > { %553 = vrot.lane.b32.xlu0 %v468_v10, %s1240_s29 }
 0x1ab   : > { %555 = vrot.lane.b32.xlu1 %v472_v11, %s1240_s29 }
 0x1ad   : > { %581 = vrot.lane.b32.xlu0 %v460_v8, %s1241_s30 }
 0x1af   : > { %583 = vrot.lane.b32.xlu1 %v464_v9, %s1241_s30 }
 0x1b1   : > { %585 = vrot.lane.b32.xlu0 %v468_v10, %s1241_s30 }
 0x1b3   : > { %587 = vrot.lane.b32.xlu1 %v472_v11, %s1241_s30 }
 0x1b5   : > { %613 = vrot.lane.b32.xlu0 %v460_v8, %s1242_s3 }
 0x1b7   : > { %615 = vrot.lane.b32.xlu1 %v464_v9, %s1242_s3 }
 0x1b9   : > { %617 = vrot.lane.b32.xlu0 %v468_v10, %s1242_s3 }
 0x1bb   : > { %619 = vrot.lane.b32.xlu1 %v472_v11, %s1242_s3 }
 0x1bd   : > { %645 = vrot.lane.b32.xlu0 %v460_v8, %s1243_s4 }
 0x1bf   : > { %647 = vrot.lane.b32.xlu1 %v464_v9, %s1243_s4 }
 0x1c1   : > { %649 = vrot.lane.b32.xlu0 %v468_v10, %s1243_s4 }
 0x1c3   : > { %651 = vrot.lane.b32.xlu1 %v472_v11, %s1243_s4 }
 0x1c5   : > { %926 = vrot.lane.b32.xlu0 %v1397_v42, %s1244_s5 }
 0x1c7   : > { %790 = vrot.lane.b32.xlu1 %v731_v38, %s1245_s6 }
 0x1c9   : > { %958 = vrot.lane.b32.xlu0 %v1397_v42, %s1246_s7 }
 0x1cb   : > { %806 = vrot.lane.b32.xlu1 %v763_v39, %s1245_s6 }
 0x1cd   : > { %990 = vrot.lane.b32.xlu0 %v1397_v42, %s1247_s8 }
 0x1cf   : > { %928 = vrot.lane.b32.xlu1 %v1405_v46, %s1244_s5 }
 0x1d1   : > { %1022 = vrot.lane.b32.xlu0 %v1397_v42, %s1248_s10 }
 0x1d3   : > { %960 = vrot.lane.b32.xlu1 %v1405_v46, %s1246_s7 }
 0x1d5   : > { %1054 = vrot.lane.b32.xlu0 %v1397_v42, %s1249_s11 }
 0x1d7   : > { %992 = vrot.lane.b32.xlu1 %v1405_v46, %s1247_s8 }
 0x1d9   : > { %1086 = vrot.lane.b32.xlu0 %v1397_v42, %s1250_s12 }
 0x1db   : > { %1024 = vrot.lane.b32.xlu1 %v1405_v46, %s1248_s10 }
 0x1dd   : > { %493 = vrot.lane.b32.xlu0 %v1368_v26, %s1235_s20 }
 0x1df   : > { %1056 = vrot.lane.b32.xlu1 %v1405_v46, %s1249_s11 }
 0x1e1   : > { %525 = vrot.lane.b32.xlu0 %v1368_v26, %s1232_s17 }
 0x1e3   : > { %1088 = vrot.lane.b32.xlu1 %v1405_v46, %s1250_s12 }
 0x1e5   : > { %557 = vrot.lane.b32.xlu0 %v1368_v26, %s1240_s29 }
 0x1e7   : > { %495 = vrot.lane.b32.xlu1 %v1383_v34, %s1235_s20 }
 0x1e9   : > { %589 = vrot.lane.b32.xlu0 %v1368_v26, %s1241_s30 }
 0x1eb   : > { %527 = vrot.lane.b32.xlu1 %v1383_v34, %s1232_s17 }
 0x1ed   : > { %621 = vrot.lane.b32.xlu0 %v1368_v26, %s1242_s3 }
 0x1ef   : > { %559 = vrot.lane.b32.xlu1 %v1383_v34, %s1240_s29  ;;  %v482_v12 = vpop.permute.xlu0 %481 }
 0x1f0   : > { %505 = vst.msk [vmem:[%s1314_s28 + $0x1] sm:$0x1] %vm440_vm12, %v482_v12 }
 0x1f1   : > { %v484_v13 = vpop.permute.xlu1 %483  ;;  %653 = vrot.lane.b32.xlu0 %v1368_v26, %s1243_s4 }
 0x1f2   : > { %506 = vst.msk [vmem:[%s1314_s28 + $0x11] sm:$0x1] %vm440_vm12, %v484_v13 }
 0x1f3   : > { %591 = vrot.lane.b32.xlu1 %v1383_v34, %s1241_s30  ;;  %v514_v14 = vpop.permute.xlu0 %513 }
 0x1f4   : > { %537 = vst.msk [vmem:[%s1314_s28 + $0x2] sm:$0x1] %vm440_vm12, %v514_v14 }
 0x1f5   : > { %v516_v15 = vpop.permute.xlu1 %515  ;;  %788 = vrot.lane.b32.xlu0 %v727_v50, %s1245_s6 }
 0x1f6   : > { %538 = vst.msk [vmem:[%s1314_s28 + $0x12] sm:$0x1] %vm440_vm12, %v516_v15 }
 0x1f7   : > { %623 = vrot.lane.b32.xlu1 %v1383_v34, %s1242_s3  ;;  %v546_v16 = vpop.permute.xlu0 %545 }
 0x1f8   : > { %569 = vst.msk [vmem:[%s1314_s28 + $0x3] sm:$0x1] %vm440_vm12, %v546_v16 }
 0x1f9   : > { %v548_v17 = vpop.permute.xlu1 %547  ;;  %804 = vrot.lane.b32.xlu0 %v759_v51, %s1245_s6 }
 0x1fa   : > { %570 = vst.msk [vmem:[%s1314_s28 + $0x13] sm:$0x1] %vm440_vm12, %v548_v17 }
 0x1fb   : > { %655 = vrot.lane.b32.xlu1 %v1383_v34, %s1243_s4  ;;  %v578_v18 = vpop.permute.xlu0 %577 }
 0x1fc   : > { %601 = vst.msk [vmem:[%s1314_s28 + $0x4] sm:$0x1] %vm440_vm12, %v578_v18 }
 0x1fd   : > { %v580_v19 = vpop.permute.xlu1 %579  ;;  %930 = vrot.lane.b32.xlu0 %v1411_v48, %s1244_s5 }
 0x1fe   : > { %602 = vst.msk [vmem:[%s1314_s28 + $0x14] sm:$0x1] %vm440_vm12, %v580_v19 }
 0x1ff   : > { %794 = vrot.lane.b32.xlu1 %v739_v54, %s1245_s6  ;;  %v610_v20 = vpop.permute.xlu0 %609 }
 0x200   : > { %633 = vst.msk [vmem:[%s1314_s28 + $0x5] sm:$0x1] %vm440_vm12, %v610_v20 }
 0x201   : > { %v612_v21 = vpop.permute.xlu1 %611  ;;  %934 = vrot.lane.b32.xlu0 %v1400_v43, %s1244_s5 }
 0x202   : > { %634 = vst.msk [vmem:[%s1314_s28 + $0x15] sm:$0x1] %vm440_vm12, %v612_v21 }
 0x203   : > { %798 = vrot.lane.b32.xlu1 %v747_v60, %s1245_s6  ;;  %v642_v22 = vpop.permute.xlu0 %641 }
 0x204   : > { %665 = vst.msk [vmem:[%s1314_s28 + $0x6] sm:$0x1] %vm440_vm12, %v642_v22 }
 0x205   : > { %v644_v23 = vpop.permute.xlu1 %643  ;;  %962 = vrot.lane.b32.xlu0 %v1411_v48, %s1246_s7 }
 0x206   : > { %666 = vst.msk [vmem:[%s1314_s28 + $0x16] sm:$0x1] %vm440_vm12, %v644_v23 }
 0x207   : > { %810 = vrot.lane.b32.xlu1 %v771_v62, %s1245_s6  ;;  %v486_v25 = vpop.permute.xlu0 %485 }
 0x208   : > { %507 = vst.msk [vmem:[%s1314_s28 + $0x21] sm:$0x1] %vm440_vm12, %v486_v25 }
 0x209   : > { %v488_v26 = vpop.permute.xlu1 %487  ;;  %966 = vrot.lane.b32.xlu0 %v1400_v43, %s1246_s7 }
 0x20a   : > { %508 = vst.msk [vmem:[%s1314_s28 + $0x31] sm:$0x1] %vm440_vm12, %v488_v26 }
 0x20b   : > { %814 = vrot.lane.b32.xlu1 %v779_v63, %s1245_s6  ;;  %v490_v27 = vpop.permute.xlu0 %489 }
 0x20c   : > { %509 = vst.msk [vmem:[%s1314_s28 + $0x41] sm:$0x1] %vm440_vm12, %v490_v27 }
 0x20d   : > { %v492_v28 = vpop.permute.xlu1 %491  ;;  %994 = vrot.lane.b32.xlu0 %v1411_v48, %s1247_s8 }
 0x20e   : > { %510 = vst.msk [vmem:[%s1314_s28 + $0x51] sm:$0x1] %vm440_vm12, %v492_v28 }
 0x20f   : > { %932 = vrot.lane.b32.xlu1 %v1421_v52, %s1244_s5  ;;  %v518_v29 = vpop.permute.xlu0 %517 }
 0x210   : > { %539 = vst.msk [vmem:[%s1314_s28 + $0x22] sm:$0x1] %vm440_vm12, %v518_v29 }
 0x211   : > { %v520_v30 = vpop.permute.xlu1 %519  ;;  %998 = vrot.lane.b32.xlu0 %v1400_v43, %s1247_s8 }
 0x212   : > { %540 = vst.msk [vmem:[%s1314_s28 + $0x32] sm:$0x1] %vm440_vm12, %v520_v30 }
 0x213   : > { %936 = vrot.lane.b32.xlu1 %v1408_v47, %s1244_s5  ;;  %v522_v31 = vpop.permute.xlu0 %521 }
 0x214   : > { %541 = vst.msk [vmem:[%s1314_s28 + $0x42] sm:$0x1] %vm440_vm12, %v522_v31 }
 0x215   : > { %v524_v32 = vpop.permute.xlu1 %523  ;;  %1026 = vrot.lane.b32.xlu0 %v1411_v48, %s1248_s10 }
 0x216   : > { %542 = vst.msk [vmem:[%s1314_s28 + $0x52] sm:$0x1] %vm440_vm12, %v524_v32 }
 0x217   : > { %964 = vrot.lane.b32.xlu1 %v1421_v52, %s1246_s7  ;;  %v550_v33 = vpop.permute.xlu0 %549 }
 0x218   : > { %571 = vst.msk [vmem:[%s1314_s28 + $0x23] sm:$0x1] %vm440_vm12, %v550_v33 }
 0x219   : > { %v552_v34 = vpop.permute.xlu1 %551  ;;  %1030 = vrot.lane.b32.xlu0 %v1400_v43, %s1248_s10 }
 0x21a   : > { %572 = vst.msk [vmem:[%s1314_s28 + $0x33] sm:$0x1] %vm440_vm12, %v552_v34 }
 0x21b   : > { %968 = vrot.lane.b32.xlu1 %v1408_v47, %s1246_s7  ;;  %v554_v36 = vpop.permute.xlu0 %553 }
 0x21c   : > { %573 = vst.msk [vmem:[%s1314_s28 + $0x43] sm:$0x1] %vm440_vm12, %v554_v36 }
 0x21d   : > { %v556_v37 = vpop.permute.xlu1 %555  ;;  %1058 = vrot.lane.b32.xlu0 %v1411_v48, %s1249_s11 }
 0x21e   : > { %574 = vst.msk [vmem:[%s1314_s28 + $0x53] sm:$0x1] %vm440_vm12, %v556_v37 }
 0x21f   : > { %996 = vrot.lane.b32.xlu1 %v1421_v52, %s1247_s8  ;;  %v582_v38 = vpop.permute.xlu0 %581 }
 0x220   : > { %603 = vst.msk [vmem:[%s1314_s28 + $0x24] sm:$0x1] %vm440_vm12, %v582_v38 }
 0x221   : > { %v584_v39 = vpop.permute.xlu1 %583  ;;  %1062 = vrot.lane.b32.xlu0 %v1400_v43, %s1249_s11 }
 0x222   : > { %604 = vst.msk [vmem:[%s1314_s28 + $0x34] sm:$0x1] %vm440_vm12, %v584_v39 }
 0x223   : > { %1000 = vrot.lane.b32.xlu1 %v1408_v47, %s1247_s8  ;;  %v586_v40 = vpop.permute.xlu0 %585 }
 0x224   : > { %605 = vst.msk [vmem:[%s1314_s28 + $0x44] sm:$0x1] %vm440_vm12, %v586_v40 }
 0x225   : > { %v588_v41 = vpop.permute.xlu1 %587  ;;  %1090 = vrot.lane.b32.xlu0 %v1411_v48, %s1250_s12 }
 0x226   : > { %606 = vst.msk [vmem:[%s1314_s28 + $0x54] sm:$0x1] %vm440_vm12, %v588_v41 }
 0x227   : > { %1028 = vrot.lane.b32.xlu1 %v1421_v52, %s1248_s10  ;;  %v614_v42 = vpop.permute.xlu0 %613 }
 0x228   : > { %635 = vst.msk [vmem:[%s1314_s28 + $0x25] sm:$0x1] %vm440_vm12, %v614_v42 }
 0x229   : > { %v616_v44 = vpop.permute.xlu1 %615  ;;  %1094 = vrot.lane.b32.xlu0 %v1400_v43, %s1250_s12 }
 0x22a   : > { %636 = vst.msk [vmem:[%s1314_s28 + $0x35] sm:$0x1] %vm440_vm12, %v616_v44 }
 0x22b   : > { %1032 = vrot.lane.b32.xlu1 %v1408_v47, %s1248_s10  ;;  %v618_v45 = vpop.permute.xlu0 %617 }
 0x22c   : > { %637 = vst.msk [vmem:[%s1314_s28 + $0x45] sm:$0x1] %vm440_vm12, %v618_v45 }
 0x22d   : > { %v620_v46 = vpop.permute.xlu1 %619  ;;  %792 = vrot.lane.b32.xlu0 %v735_v58, %s1245_s6 }
 0x22e   : > { %638 = vst.msk [vmem:[%s1314_s28 + $0x55] sm:$0x1] %vm440_vm12, %v620_v46 }
 0x22f   : > { %1060 = vrot.lane.b32.xlu1 %v1421_v52, %s1249_s11  ;;  %v646_v43 = vpop.permute.xlu0 %645 }
 0x230   : > { %667 = vst.msk [vmem:[%s1314_s28 + $0x26] sm:$0x1] %vm440_vm12, %v646_v43 }
 0x231   : > { %v648_v48 = vpop.permute.xlu1 %647  ;;  %796 = vrot.lane.b32.xlu0 %v743_v61, %s1245_s6 }
 0x232   : > { %668 = vst.msk [vmem:[%s1314_s28 + $0x36] sm:$0x1] %vm440_vm12, %v648_v48 }
 0x233   : > { %1064 = vrot.lane.b32.xlu1 %v1408_v47, %s1249_s11  ;;  %v650_v35 = vpop.permute.xlu0 %649 }
 0x234   : > { %669 = vst.msk [vmem:[%s1314_s28 + $0x46] sm:$0x1] %vm440_vm12, %v650_v35 }
 0x235   : > { %v652_v50 = vpop.permute.xlu1 %651  ;;  %808 = vrot.lane.b32.xlu0 %v767_v0, %s1245_s6 }
 0x236   : > { %670 = vst.msk [vmem:[%s1314_s28 + $0x56] sm:$0x1] %vm440_vm12, %v652_v50 }
 0x237   : > { %1092 = vrot.lane.b32.xlu1 %v1421_v52, %s1250_s12  ;;  %v927_v51 = vpop.permute.xlu0 %926 }
 0x238   : > { %950 = vst.msk [vmem:[%s1314_s28 + $0x8] sm:$0x1] %vm440_vm12, %v927_v51 }
 0x239   : > { %v1729_v54 = vpop.permute.xlu1 %790  ;;  %812 = vrot.lane.b32.xlu0 %v775_v1, %s1245_s6 }
 0x23b   : > { %1096 = vrot.lane.b32.xlu1 %v1408_v47, %s1250_s12  ;;  %v959_v55 = vpop.permute.xlu0 %958 }
 0x23c   : > { %982 = vst.msk [vmem:[%s1314_s28 + $0x9] sm:$0x1] %vm440_vm12, %v959_v55 }
 0x23d   : > { %v1739_v56 = vpop.permute.xlu1 %806  ;;  %938 = vrot.lane.b32.xlu0 %v1414_v49, %s1244_s5 }
 0x23f   : > { %802 = vrot.lane.b32.xlu1 %v755_v3, %s1245_s6  ;;  %v991_v52 = vpop.permute.xlu0 %990 }
 0x240   : > { %1014 = vst.msk [vmem:[%s1314_s28 + $0xa] sm:$0x1] %vm440_vm12, %v991_v52 }
 0x241   : > { %v929_v57 = vpop.permute.xlu1 %928  ;;  %970 = vrot.lane.b32.xlu0 %v1414_v49, %s1246_s7 }
 0x242   : > { %951 = vst.msk [vmem:[%s1314_s28 + $0x18] sm:$0x1] %vm440_vm12, %v929_v57 }
 0x243   : > { %818 = vrot.lane.b32.xlu1 %v787_v6, %s1245_s6  ;;  %v1023_v47 = vpop.permute.xlu0 %1022 }
 0x244   : > { %1046 = vst.msk [vmem:[%s1314_s28 + $0xb] sm:$0x1] %vm440_vm12, %v1023_v47 }
 0x245   : > { %v961_v58 = vpop.permute.xlu1 %960  ;;  %1002 = vrot.lane.b32.xlu0 %v1414_v49, %s1247_s8 }
 0x246   : > { %983 = vst.msk [vmem:[%s1314_s28 + $0x19] sm:$0x1] %vm440_vm12, %v961_v58 }
 0x247   : > { %940 = vrot.lane.b32.xlu1 %v1424_v53, %s1244_s5  ;;  %v1055_v60 = vpop.permute.xlu0 %1054 }
 0x248   : > { %1078 = vst.msk [vmem:[%s1314_s28 + $0xc] sm:$0x1] %vm440_vm12, %v1055_v60 }
 0x249   : > { %v993_v24 = vpop.permute.xlu1 %992  ;;  %1034 = vrot.lane.b32.xlu0 %v1414_v49, %s1248_s10 }
 0x24a   : > { %1015 = vst.msk [vmem:[%s1314_s28 + $0x1a] sm:$0x1] %vm440_vm12, %v993_v24 }
 0x24b   : > { %972 = vrot.lane.b32.xlu1 %v1424_v53, %s1246_s7  ;;  %v1087_v61 = vpop.permute.xlu0 %1086 }
 0x24c   : > { %1110 = vst.msk [vmem:[%s1314_s28 + $0xd] sm:$0x1] %vm440_vm12, %v1087_v61 }
 0x24d   : > { %v1025_v62 = vpop.permute.xlu1 %1024  ;;  %1066 = vrot.lane.b32.xlu0 %v1414_v49, %s1249_s11 }
 0x24e   : > { %1047 = vst.msk [vmem:[%s1314_s28 + $0x1b] sm:$0x1] %vm440_vm12, %v1025_v62 }
 0x24f   : > { %1004 = vrot.lane.b32.xlu1 %v1424_v53, %s1247_s8  ;;  %v494_v63 = vpop.permute.xlu0 %493 }
 0x250   : > { %511 = vst.msk [vmem:[%s1314_s28 + $0x61] sm:$0x1] %vm440_vm12, %v494_v63 }
 0x251   : > { %v1057_v0 = vpop.permute.xlu1 %1056  ;;  %800 = vrot.lane.b32.xlu0 %v751_v5, %s1245_s6 }
 0x252   : > { %1079 = vst.msk [vmem:[%s1314_s28 + $0x1c] sm:$0x1] %vm440_vm12, %v1057_v0 }
 0x253   : > { %1036 = vrot.lane.b32.xlu1 %v1424_v53, %s1248_s10  ;;  %v526_v1 = vpop.permute.xlu0 %525 }
 0x254   : > { %543 = vst.msk [vmem:[%s1314_s28 + $0x62] sm:$0x1] %vm440_vm12, %v526_v1 }
 0x255   : > { %v1089_v3 = vpop.permute.xlu1 %1088  ;;  %816 = vrot.lane.b32.xlu0 %v783_v7, %s1245_s6 }
 0x256   : > { %1111 = vst.msk [vmem:[%s1314_s28 + $0x1d] sm:$0x1] %vm440_vm12, %v1089_v3 }
 0x257   : > { %1068 = vrot.lane.b32.xlu1 %v1424_v53, %s1249_s11  ;;  %v558_v59 = vpop.permute.xlu0 %557 }
 0x258   : > { %575 = vst.msk [vmem:[%s1314_s28 + $0x63] sm:$0x1] %vm440_vm12, %v558_v59 }
 0x259   : > { %v496_v5 = vpop.permute.xlu1 %495  ;;  %1098 = vrot.lane.b32.xlu0 %v1414_v49, %s1250_s12 }
 0x25a   : > { %512 = vst.msk [vmem:[%s1314_s28 + $0x71] sm:$0x1] %vm440_vm12, %v496_v5 }
 0x25b   : > { %1100 = vrot.lane.b32.xlu1 %v1424_v53, %s1250_s12  ;;  %v590_v2 = vpop.permute.xlu0 %589 }
 0x25c   : > { %607 = vst.msk [vmem:[%s1314_s28 + $0x64] sm:$0x1] %vm440_vm12, %v590_v2 }
 0x25d   : > { %v528_v4 = vpop.permute.xlu1 %527 }
 0x25e   : > { %544 = vst.msk [vmem:[%s1314_s28 + $0x72] sm:$0x1] %vm440_vm12, %v528_v4 }
 0x25f   : > { %v622_v6 = vpop.permute.xlu0 %621 }
 0x260   : > { %639 = vst.msk [vmem:[%s1314_s28 + $0x65] sm:$0x1] %vm440_vm12, %v622_v6 }
 0x261   : > { %v560_v7 = vpop.permute.xlu1 %559 }
 0x262   : > { %576 = vst.msk [vmem:[%s1314_s28 + $0x73] sm:$0x1] %vm440_vm12, %v560_v7 }
 0x263   : > { %v654_v49 = vpop.permute.xlu0 %653 }
 0x264   : > { %671 = vst.msk [vmem:[%s1314_s28 + $0x66] sm:$0x1] %vm440_vm12, %v654_v49 }
 0x265   : > { %v592_v53 = vpop.permute.xlu1 %591 }
 0x266   : > { %608 = vst.msk [vmem:[%s1314_s28 + $0x74] sm:$0x1] %vm440_vm12, %v592_v53 }
 0x267   : > { %v789_v8 = vpop.permute.xlu0 %788 }
 0x268   : > { %v821_v9 = vsel %vm820_vm13, %v789_v8, %v1729_v54 }
 0x269   : > { %v624_v10 = vpop.permute.xlu1 %623  ;;  %837 = vst.msk [vmem:[%s1314_s28 + $0x7] sm:$0x1] %vm440_vm12, %v821_v9 }
 0x26a   : > { %640 = vst.msk [vmem:[%s1314_s28 + $0x75] sm:$0x1] %vm440_vm12, %v624_v10 }
 0x26b   : > { %v805_v11 = vpop.permute.xlu0 %804 }
 0x26c   : > { %v825_v12 = vsel %vm820_vm13, %v805_v11, %v1739_v56 }
 0x26d   : > { %v656_v13 = vpop.permute.xlu1 %655  ;;  %841 = vst.msk [vmem:[%s1314_s28 + $0x47] sm:$0x1] %vm440_vm12, %v825_v12 }
 0x26e   : > { %672 = vst.msk [vmem:[%s1314_s28 + $0x76] sm:$0x1] %vm440_vm12, %v656_v13 }
 0x26f   : > { %v931_v14 = vpop.permute.xlu0 %930 }
 0x270   : > { %952 = vst.msk [vmem:[%s1314_s28 + $0x28] sm:$0x1] %vm440_vm12, %v931_v14 }
 0x271   : > { %v795_v15 = vpop.permute.xlu1 %794 }
 0x273   : > { %v935_v16 = vpop.permute.xlu0 %934 }
 0x274   : > { %954 = vst.msk [vmem:[%s1314_s28 + $0x48] sm:$0x1] %vm440_vm12, %v935_v16 }
 0x275   : > { %v799_v17 = vpop.permute.xlu1 %798 }
 0x277   : > { %v963_v18 = vpop.permute.xlu0 %962 }
 0x278   : > { %984 = vst.msk [vmem:[%s1314_s28 + $0x29] sm:$0x1] %vm440_vm12, %v963_v18 }
 0x279   : > { %v811_v19 = vpop.permute.xlu1 %810 }
 0x27b   : > { %v967_v20 = vpop.permute.xlu0 %966 }
 0x27c   : > { %986 = vst.msk [vmem:[%s1314_s28 + $0x49] sm:$0x1] %vm440_vm12, %v967_v20 }
 0x27d   : > { %v815_v21 = vpop.permute.xlu1 %814 }
 0x27f   : > { %v995_v22 = vpop.permute.xlu0 %994 }
 0x280   : > { %1016 = vst.msk [vmem:[%s1314_s28 + $0x2a] sm:$0x1] %vm440_vm12, %v995_v22 }
 0x281   : > { %v933_v23 = vpop.permute.xlu1 %932 }
 0x282   : > { %953 = vst.msk [vmem:[%s1314_s28 + $0x38] sm:$0x1] %vm440_vm12, %v933_v23 }
 0x283   : > { %v999_v25 = vpop.permute.xlu0 %998 }
 0x284   : > { %1018 = vst.msk [vmem:[%s1314_s28 + $0x4a] sm:$0x1] %vm440_vm12, %v999_v25 }
 0x285   : > { %v937_v26 = vpop.permute.xlu1 %936 }
 0x286   : > { %955 = vst.msk [vmem:[%s1314_s28 + $0x58] sm:$0x1] %vm440_vm12, %v937_v26 }
 0x287   : > { %v1027_v27 = vpop.permute.xlu0 %1026 }
 0x288   : > { %1048 = vst.msk [vmem:[%s1314_s28 + $0x2b] sm:$0x1] %vm440_vm12, %v1027_v27 }
 0x289   : > { %v965_v28 = vpop.permute.xlu1 %964 }
 0x28a   : > { %985 = vst.msk [vmem:[%s1314_s28 + $0x39] sm:$0x1] %vm440_vm12, %v965_v28 }
 0x28b   : > { %v1031_v29 = vpop.permute.xlu0 %1030 }
 0x28c   : > { %1050 = vst.msk [vmem:[%s1314_s28 + $0x4b] sm:$0x1] %vm440_vm12, %v1031_v29 }
 0x28d   : > { %v969_v30 = vpop.permute.xlu1 %968 }
 0x28e   : > { %987 = vst.msk [vmem:[%s1314_s28 + $0x59] sm:$0x1] %vm440_vm12, %v969_v30 }
 0x28f   : > { %v1059_v31 = vpop.permute.xlu0 %1058 }
 0x290   : > { %1080 = vst.msk [vmem:[%s1314_s28 + $0x2c] sm:$0x1] %vm440_vm12, %v1059_v31 }
 0x291   : > { %v997_v32 = vpop.permute.xlu1 %996 }
 0x292   : > { %1017 = vst.msk [vmem:[%s1314_s28 + $0x3a] sm:$0x1] %vm440_vm12, %v997_v32 }
 0x293   : > { %v1063_v33 = vpop.permute.xlu0 %1062 }
 0x294   : > { %1082 = vst.msk [vmem:[%s1314_s28 + $0x4c] sm:$0x1] %vm440_vm12, %v1063_v33 }
 0x295   : > { %v1001_v34 = vpop.permute.xlu1 %1000 }
 0x296   : > { %1019 = vst.msk [vmem:[%s1314_s28 + $0x5a] sm:$0x1] %vm440_vm12, %v1001_v34 }
 0x297   : > { %v1091_v36 = vpop.permute.xlu0 %1090 }
 0x298   : > { %1112 = vst.msk [vmem:[%s1314_s28 + $0x2d] sm:$0x1] %vm440_vm12, %v1091_v36 }
 0x299   : > { %v1029_v37 = vpop.permute.xlu1 %1028 }
 0x29a   : > { %1049 = vst.msk [vmem:[%s1314_s28 + $0x3b] sm:$0x1] %vm440_vm12, %v1029_v37 }
 0x29b   : > { %v1095_v38 = vpop.permute.xlu0 %1094 }
 0x29c   : > { %1114 = vst.msk [vmem:[%s1314_s28 + $0x4d] sm:$0x1] %vm440_vm12, %v1095_v38 }
 0x29d   : > { %v1033_v39 = vpop.permute.xlu1 %1032 }
 0x29e   : > { %1051 = vst.msk [vmem:[%s1314_s28 + $0x5b] sm:$0x1] %vm440_vm12, %v1033_v39 }
 0x29f   : > { %v793_v40 = vpop.permute.xlu0 %792 }
 0x2a0   : > { %v822_v41 = vsel %vm820_vm13, %v793_v40, %v795_v15 }
 0x2a1   : > { %v1061_v42 = vpop.permute.xlu1 %1060  ;;  %838 = vst.msk [vmem:[%s1314_s28 + $0x17] sm:$0x1] %vm440_vm12, %v822_v41 }
 0x2a2   : > { %1081 = vst.msk [vmem:[%s1314_s28 + $0x3c] sm:$0x1] %vm440_vm12, %v1061_v42 }
 0x2a3   : > { %v797_v44 = vpop.permute.xlu0 %796 }
 0x2a4   : > { %v823_v45 = vsel %vm820_vm13, %v797_v44, %v799_v17 }
 0x2a5   : > { %v1065_v46 = vpop.permute.xlu1 %1064  ;;  %839 = vst.msk [vmem:[%s1314_s28 + $0x27] sm:$0x1] %vm440_vm12, %v823_v45 }
 0x2a6   : > { %1083 = vst.msk [vmem:[%s1314_s28 + $0x5c] sm:$0x1] %vm440_vm12, %v1065_v46 }
 0x2a7   : > { %v809_v43 = vpop.permute.xlu0 %808 }
 0x2a8   : > { %v826_v48 = vsel %vm820_vm13, %v809_v43, %v811_v19 }
 0x2a9   : > { %v1093_v35 = vpop.permute.xlu1 %1092  ;;  %842 = vst.msk [vmem:[%s1314_s28 + $0x57] sm:$0x1] %vm440_vm12, %v826_v48 }
 0x2aa   : > { %1113 = vst.msk [vmem:[%s1314_s28 + $0x3d] sm:$0x1] %vm440_vm12, %v1093_v35 }
 0x2ab   : > { %v813_v50 = vpop.permute.xlu0 %812 }
 0x2ac   : > { %v827_v51 = vsel %vm820_vm13, %v813_v50, %v815_v21 }
 0x2ad   : > { %v1097_v54 = vpop.permute.xlu1 %1096  ;;  %843 = vst.msk [vmem:[%s1314_s28 + $0x67] sm:$0x1] %vm440_vm12, %v827_v51 }
 0x2ae   : > { %1115 = vst.msk [vmem:[%s1314_s28 + $0x5d] sm:$0x1] %vm440_vm12, %v1097_v54 }
 0x2af   : > { %v939_v55 = vpop.permute.xlu0 %938 }
 0x2b0   : > { %956 = vst.msk [vmem:[%s1314_s28 + $0x68] sm:$0x1] %vm440_vm12, %v939_v55 }
 0x2b1   : > { %v803_v56 = vpop.permute.xlu1 %802 }
 0x2b3   : > { %v971_v52 = vpop.permute.xlu0 %970 }
 0x2b4   : > { %988 = vst.msk [vmem:[%s1314_s28 + $0x69] sm:$0x1] %vm440_vm12, %v971_v52 }
 0x2b5   : > { %v819_v57 = vpop.permute.xlu1 %818 }
 0x2b7   : > { %v1003_v47 = vpop.permute.xlu0 %1002 }
 0x2b8   : > { %1020 = vst.msk [vmem:[%s1314_s28 + $0x6a] sm:$0x1] %vm440_vm12, %v1003_v47 }
 0x2b9   : > { %v941_v58 = vpop.permute.xlu1 %940 }
 0x2ba   : > { %957 = vst.msk [vmem:[%s1314_s28 + $0x78] sm:$0x1] %vm440_vm12, %v941_v58 }
 0x2bb   : > { %v1035_v60 = vpop.permute.xlu0 %1034 }
 0x2bc   : > { %1052 = vst.msk [vmem:[%s1314_s28 + $0x6b] sm:$0x1] %vm440_vm12, %v1035_v60 }
 0x2bd   : > { %v973_v24 = vpop.permute.xlu1 %972 }
 0x2be   : > { %989 = vst.msk [vmem:[%s1314_s28 + $0x79] sm:$0x1] %vm440_vm12, %v973_v24 }
 0x2bf   : > { %v1067_v61 = vpop.permute.xlu0 %1066 }
 0x2c0   : > { %1084 = vst.msk [vmem:[%s1314_s28 + $0x6c] sm:$0x1] %vm440_vm12, %v1067_v61 }
 0x2c1   : > { %v1005_v62 = vpop.permute.xlu1 %1004 }
 0x2c2   : > { %1021 = vst.msk [vmem:[%s1314_s28 + $0x7a] sm:$0x1] %vm440_vm12, %v1005_v62 }
 0x2c3   : > { %v801_v63 = vpop.permute.xlu0 %800 }
 0x2c4   : > { %v824_v0 = vsel %vm820_vm13, %v801_v63, %v803_v56 }
 0x2c5   : > { %v1037_v1 = vpop.permute.xlu1 %1036  ;;  %840 = vst.msk [vmem:[%s1314_s28 + $0x37] sm:$0x1] %vm440_vm12, %v824_v0 }
 0x2c6   : > { %1053 = vst.msk [vmem:[%s1314_s28 + $0x7b] sm:$0x1] %vm440_vm12, %v1037_v1 }
 0x2c7   : > { %v817_v3 = vpop.permute.xlu0 %816 }
 0x2c8   : > { %v828_v59 = vsel %vm820_vm13, %v817_v3, %v819_v57 }
 0x2c9   : > { %v1069_v5 = vpop.permute.xlu1 %1068  ;;  %844 = vst.msk [vmem:[%s1314_s28 + $0x77] sm:$0x1] %vm440_vm12, %v828_v59 }
 0x2ca   : > { %1085 = vst.msk [vmem:[%s1314_s28 + $0x7c] sm:$0x1] %vm440_vm12, %v1069_v5 }
 0x2cb   : > { %v1099_v2 = vpop.permute.xlu0 %1098 }
 0x2cc   : > { %1116 = vst.msk [vmem:[%s1314_s28 + $0x6d] sm:$0x1] %vm440_vm12, %v1099_v2 }
 0x2cd   : > { %v1101_v4 = vpop.permute.xlu1 %1100 }
 0x2ce   : > { %1117 = vst.msk [vmem:[%s1314_s28 + $0x7d] sm:$0x1] %vm440_vm12, %v1101_v4 }
 0x2cf PF: > { %s12_s9 = sadd.s32 1, %s1228_s9  }
 0x2d0   : > { %p9_p4 = scmp.ge.s32.totalorder %s12_s9, 4  }
 0x2d2   :  { %11 = sbr.rel (!%p9_p4) target bundleno = 1 (0x1), region = 58 }

</bundles_post_ra>
